<compile_context>
chip_gen: v5e
topology: v5e:2x2
jax: 0.10.0
libtpu: 0.0.40
codegen_flags: <defaults>
</compile_context>

<pallas_src>
import functools

import jax
import jax.numpy as jnp
from jax import lax
from jax.experimental import pallas as pl
from jax.experimental.pallas import tpu as pltpu

MU = 0.9  # Hw.mu default
_VMEM_LIMIT = 48 * 1024 * 1024  # safe on v5e/v6e (128 MiB) and v7x (64 MiB)


def _round_up(x, m):
    return ((x + m - 1) // m) * m


# ---------------------------------------------------------------------------
# Kernel 1: per-edge loop-invariant precompute (hoisted out of the T loop)
#   A[e, i*s+j] = tanh(X[e] @ Wxi + bxi)[i*s+j] * (mu/s)/dg[e]   (bf16 out)
#   b[e, :]     = tanh(node_embeds[e] @ Wrou + brou)             (bf16 out)
# ---------------------------------------------------------------------------
def precompute_kernel(xn_ref, xs_ref, scale_ref, wxa_ref, wxb_ref, bxi_ref,
                      wrou_ref, brou_ref, a_ref, b_ref):
    # Xi: Linear(2*ln -> s*s), split over the node/neighbor halves of X so we
    # never lane-slice inside the kernel.  bf16 MXU operands, f32 accumulate.
    a = jnp.tanh(
        jnp.dot(xn_ref[...], wxa_ref[...], preferred_element_type=jnp.float32)
        + jnp.dot(xs_ref[...], wxb_ref[...], preferred_element_type=jnp.float32)
        + bxi_ref[...])                                      # (tE, s*s) f32
    # scale = (mu/s)/max(dg,1) precomputed in the wrapper; 0 on padded edges.
    a_ref[...] = (a * scale_ref[...]).astype(jnp.bfloat16)

    # Rou: Linear(ln -> s) on the node half only.
    b_ref[...] = jnp.tanh(
        jnp.dot(xn_ref[...], wrou_ref[...], preferred_element_type=jnp.float32)
        + brou_ref[...]).astype(jnp.bfloat16)                # (tE, s) bf16


# ---------------------------------------------------------------------------
# Kernel 2: T fused message-passing iterations, grid = (T, E_tiles).
#   out_ref holds the current node states (VMEM-resident, constant block);
#   new_ref accumulates the AggrSum scatter across E tiles.
#   The one-hot gather/scatter mask is built in-kernel from int32 indices.
# ---------------------------------------------------------------------------
def gnn_steps_kernel(a_ref, b_ref, idx_ref, sel_ref, out_ref, new_ref,
                     *, num_nodes, s):
    t = pl.program_id(0)
    et = pl.program_id(1)

    @pl.when(jnp.logical_and(t == 0, et == 0))
    def _init_states():
        out_ref[...] = jnp.zeros_like(out_ref)               # node_states = 0

    @pl.when(et == 0)
    def _init_accum():
        new_ref[...] = jnp.zeros_like(new_ref)

    # Build the (V, tile_e) one-hot mask from the lane-dense index row.
    # Padded edges carry the sentinel index V -> all-zero column (no effect).
    idx = idx_ref[...]                                       # (1, tE) int32
    viota = lax.broadcasted_iota(jnp.int32, (num_nodes, idx.shape[1]), 0)
    mask = (viota == idx).astype(jnp.bfloat16)               # (V, tE)

    # Gather H[e, :] = states[X_Node[e], :] via transposed-LHS MXU contraction.
    # bf16 states: per-step rounding vs. the f32 torch reference is accepted.
    states = out_ref[...].astype(jnp.bfloat16)               # (V, s)
    H = lax.dot_general(mask, states, (((0,), (0,)), ((), ())),
                        preferred_element_type=jnp.float32)  # (tE, s) f32

    # Batched mat-vec AH[e, i] = sum_j A[e, i*s+j] * H[e, j] as one matmul
    # against the hoisted constant block selector (bf16 MXU, s-term f32 sum).
    A = a_ref[...]                                           # (tE, s*s) bf16
    H_rep = jnp.tile(H, (1, s))                              # (tE, s*s) f32
    AH = jnp.dot((A * H_rep).astype(jnp.bfloat16), sel_ref[...],
                 preferred_element_type=jnp.float32)         # (tE, s) f32

    Hn = (AH + b_ref[...].astype(jnp.float32)).astype(jnp.bfloat16)

    # AggrSum scatter: new_states[v, :] += sum_{e: X_Node[e]==v} Hn[e, :]
    new_ref[...] += jnp.dot(mask, Hn, preferred_element_type=jnp.float32)

    @pl.when(et == pl.num_programs(1) - 1)
    def _commit():
        out_ref[...] = new_ref[...]                          # states for next t


# ---------------------------------------------------------------------------
# Kernel 3: readout  softmax(Linear(cat(embedding, node_states)), dim=1)
#   Lane-dense: weights zero-padded to 128 output columns, bias padded with
#   -1e30 so the pad columns vanish in the softmax; wrapper slices [:, :3].
# ---------------------------------------------------------------------------
def readout_kernel(feat_ref, w_ref, b_ref, out_ref):
    logits = (jnp.dot(feat_ref[...], w_ref[...],
                      preferred_element_type=jnp.float32) + b_ref[...])
    m = jnp.max(logits, axis=1, keepdims=True)
    e = jnp.exp(logits - m)
    out_ref[...] = e / jnp.sum(e, axis=1, keepdims=True)


class OriLinearGNNPallas:
    """JAX/Pallas port of OriLinearGNN(node_num, feat_dim, stat_dim, T)."""

    def __init__(self, node_num, feat_dim, stat_dim, T, key):
        self.V = node_num
        self.ln = feat_dim
        self.s = stat_dim
        self.T = T

        k0, k1, k2, k3, k4, k5, k6 = jax.random.split(key, 7)
        # nn.Embedding(node_num, feat_dim)
        self.node_features = jax.random.normal(k0, (node_num, feat_dim),
                                               jnp.float32)
        # Xi: Linear(2*ln -> s*s)   (stored as (in, out))
        self.w_xi = 0.1 * jax.random.normal(k1, (2 * feat_dim, stat_dim ** 2),
                                            jnp.float32)
        self.b_xi = 0.1 * jax.random.normal(k2, (1, stat_dim ** 2), jnp.float32)
        # Rou: Linear(ln -> s)
        self.w_rou = 0.1 * jax.random.normal(k3, (feat_dim, stat_dim),
                                             jnp.float32)
        self.b_rou = 0.1 * jax.random.normal(k4, (1, stat_dim), jnp.float32)
        # readout: Linear(ln + s -> 3)
        self.w_lin = 0.1 * jax.random.normal(k5, (feat_dim + stat_dim, 3),
                                             jnp.float32)
        self.b_lin = 0.1 * jax.random.normal(k6, (1, 3), jnp.float32)

    def __call__(self, X_Node, X_Neis, dg_list):
        V, ln, s, T = self.V, self.ln, self.s, self.T
        E = int(X_Node.shape[0])

        # --- edge tiling (lane-aligned, padded, bounded by the in-kernel
        #     (V, tile_e) bf16 mask intermediate ~4 MiB) ---
        tile_e = min(2048, _round_up(E, 128))
        max_tile_for_mask = max(128, ((4 * 1024 * 1024) // (2 * V)) // 128 * 128)
        tile_e = min(tile_e, max_tile_for_mask)
        E_pad = _round_up(E, tile_e)
        n_et = E_pad // tile_e
        pad_e = E_pad - E

        # --- glue: embedding gathers, padding, index/scale prep (XLA) ---
        node_embeds = self.node_features[X_Node]                       # (E, ln)
        neis_embeds = self.node_features[X_Neis]                       # (E, ln)
        xn = jnp.pad(node_embeds, ((0, pad_e), (0, 0))).astype(jnp.bfloat16)
        xs = jnp.pad(neis_embeds, ((0, pad_e), (0, 0))).astype(jnp.bfloat16)

        # per-edge scale (mu/s)/dg, guarded for zero-degree edges (PyTorch
        # would produce inf/NaN there); 0 on padded edges -> A = 0 there.
        dg = dg_list.astype(jnp.float32).reshape(-1)
        dg_safe = jnp.where(dg == 0.0, 1.0, dg)
        scale = jnp.pad((MU / s) / dg_safe, (0, pad_e)).reshape(-1, 1)  # (E_pad,1)

        # edge -> node indices, sentinel V for padded edges (all-zero mask col)
        idx = jnp.pad(X_Node.astype(jnp.int32), (0, pad_e), constant_values=V)
        idx = idx.reshape(n_et, 1, tile_e)

        # hoisted AH block selector sel[i*s+j, i'] = (i == i')
        row = jnp.arange(s * s, dtype=jnp.int32) // s
        sel = (row[:, None] == jnp.arange(s, dtype=jnp.int32)[None, :]
               ).astype(jnp.bfloat16)                                  # (s*s, s)

        w_xa = self.w_xi[:ln].astype(jnp.bfloat16)                     # (ln, s*s)
        w_xb = self.w_xi[ln:].astype(jnp.bfloat16)                     # (ln, s*s)

        # --- kernel 1: hoisted per-edge A (scale folded in, bf16) and b ---
        # (tile_e, 1) scale block pads lanes to 128 in VMEM; accepted, runs once.
        precompute = pl.pallas_call(
            precompute_kernel,
            grid=(n_et,),
            in_specs=[
                pl.BlockSpec((tile_e, ln), lambda i: (i, 0)),
                pl.BlockSpec((tile_e, ln), lambda i: (i, 0)),
                pl.BlockSpec((tile_e, 1), lambda i: (i, 0)),
                pl.BlockSpec((ln, s * s), lambda i: (0, 0)),
                pl.BlockSpec((ln, s * s), lambda i: (0, 0)),
                pl.BlockSpec((1, s * s), lambda i: (0, 0)),
                pl.BlockSpec((ln, s), lambda i: (0, 0)),
                pl.BlockSpec((1, s), lambda i: (0, 0)),
            ],
            out_specs=(
                pl.BlockSpec((tile_e, s * s), lambda i: (i, 0)),
                pl.BlockSpec((tile_e, s), lambda i: (i, 0)),
            ),
            out_shape=(
                jax.ShapeDtypeStruct((E_pad, s * s), jnp.bfloat16),
                jax.ShapeDtypeStruct((E_pad, s), jnp.bfloat16),
            ),
            compiler_params=pltpu.CompilerParams(
                dimension_semantics=("parallel",),
                vmem_limit_bytes=_VMEM_LIMIT),
        )
        A, b = precompute(xn, xs, scale,
                          w_xa, w_xb, self.b_xi,
                          self.w_rou.astype(jnp.bfloat16), self.b_rou)

        # --- kernel 2: T fused message-passing iterations ---
        steps = pl.pallas_call(
            functools.partial(gnn_steps_kernel, num_nodes=V, s=s),
            grid=(T, n_et),
            in_specs=[
                pl.BlockSpec((tile_e, s * s), lambda t, e: (e, 0)),
                pl.BlockSpec((tile_e, s), lambda t, e: (e, 0)),
                pl.BlockSpec((None, 1, tile_e), lambda t, e: (e, 0, 0)),
                pl.BlockSpec((s * s, s), lambda t, e: (0, 0)),
            ],
            out_specs=pl.BlockSpec((V, s), lambda t, e: (0, 0)),
            out_shape=jax.ShapeDtypeStruct((V, s), jnp.float32),
            scratch_shapes=[pltpu.VMEM((V, s), jnp.float32)],
            compiler_params=pltpu.CompilerParams(
                dimension_semantics=("arbitrary", "arbitrary"),
                vmem_limit_bytes=_VMEM_LIMIT),
        )
        states = steps(A, b, idx, sel)                                 # (V, s)

        # --- kernel 3: lane-dense readout, tiled over nodes ---
        tile_v = min(1024, _round_up(V, 8))
        V_pad = _round_up(V, tile_v)
        n_vt = V_pad // tile_v
        feat = jnp.concatenate([self.node_features, states], axis=1)   # (V, ln+s)
        feat = jnp.pad(feat, ((0, V_pad - V), (0, 0)))
        w_pad = jnp.zeros((ln + s, 128), jnp.float32).at[:, :3].set(self.w_lin)
        b_pad = jnp.full((1, 128), -1e30, jnp.float32).at[:, :3].set(self.b_lin)

        readout = pl.pallas_call(
            readout_kernel,
            grid=(n_vt,),
            in_specs=[
                pl.BlockSpec((tile_v, ln + s), lambda i: (i, 0)),
                pl.BlockSpec((ln + s, 128), lambda i: (0, 0)),
                pl.BlockSpec((1, 128), lambda i: (0, 0)),
            ],
            out_specs=pl.BlockSpec((tile_v, 128), lambda i: (i, 0)),
            out_shape=jax.ShapeDtypeStruct((V_pad, 128), jnp.float32),
            compiler_params=pltpu.CompilerParams(
                dimension_semantics=("parallel",),
                vmem_limit_bytes=_VMEM_LIMIT),
        )
        out = readout(feat, w_pad, b_pad)
        return out[:V, :3]                                             # (V, 3)


if __name__ == "__main__":
    node_num, feat_dim, stat_dim, T = 16, 8, 4, 2
    num_edges = 32

    key = jax.random.PRNGKey(0)
    k_model, k_src, k_dst = jax.random.split(key, 3)

    model = OriLinearGNNPallas(node_num, feat_dim, stat_dim, T, k_model)

    X_Node = jax.random.randint(k_src, (num_edges,), 0, node_num, jnp.int32)
    X_Neis = jax.random.randint(k_dst, (num_edges,), 0, node_num, jnp.int32)
    # per-edge degree of the source node (>= 1 so division is well defined)
    counts = jnp.bincount(X_Node, length=node_num)
    dg_list = jnp.maximum(counts[X_Node], 1).astype(jnp.float32)

    out = model(X_Node, X_Neis, dg_list)
    jax.block_until_ready(out)

    assert out.shape == (node_num, 3)
    assert bool(jnp.all(jnp.isfinite(out)))
    # softmax rows sum to 1
    assert bool(jnp.allclose(jnp.sum(out, axis=1), 1.0, atol=1e-5))
    print("KERNEL_OK")
</pallas_src>

<mosaic_0001>
module attributes {stable_mosaic.version = 11 : i64} {
  func.func @precompute_kernel(%arg0: i32, %arg1: memref<128x8xbf16, #tpu.memory_space<vmem>>, %arg2: memref<128x8xbf16, #tpu.memory_space<vmem>>, %arg3: memref<128x1xf32, #tpu.memory_space<vmem>>, %arg4: memref<8x16xbf16, #tpu.memory_space<vmem>>, %arg5: memref<8x16xbf16, #tpu.memory_space<vmem>>, %arg6: memref<1x16xf32, #tpu.memory_space<vmem>>, %arg7: memref<8x4xbf16, #tpu.memory_space<vmem>>, %arg8: memref<1x4xf32, #tpu.memory_space<vmem>>, %arg9: memref<128x16xbf16, #tpu.memory_space<vmem>>, %arg10: memref<128x4xbf16, #tpu.memory_space<vmem>>) attributes {dimension_semantics = [#tpu.dimension_semantics<parallel>], iteration_bounds = array<i64: 1>, scalar_prefetch = 0 : i64, scratch_operands = 0 : i64, tpu.core_type = #tpu.core_type<tc>, window_params = [{transform_indices = @transform_0, window_bounds = array<i64: 128, 8>}, {transform_indices = @transform_1, window_bounds = array<i64: 128, 8>}, {transform_indices = @transform_2, window_bounds = array<i64: 128, 1>}, {pipeline_mode = #tpu.pipeline_mode<synchronous>, transform_indices = @transform_3, window_bounds = array<i64: 8, 16>}, {pipeline_mode = #tpu.pipeline_mode<synchronous>, transform_indices = @transform_4, window_bounds = array<i64: 8, 16>}, {pipeline_mode = #tpu.pipeline_mode<synchronous>, transform_indices = @transform_5, window_bounds = array<i64: 1, 16>}, {pipeline_mode = #tpu.pipeline_mode<synchronous>, transform_indices = @transform_6, window_bounds = array<i64: 8, 4>}, {pipeline_mode = #tpu.pipeline_mode<synchronous>, transform_indices = @transform_7, window_bounds = array<i64: 1, 4>}, {transform_indices = @transform_8, window_bounds = array<i64: 128, 16>}, {transform_indices = @transform_9, window_bounds = array<i64: 128, 4>}]} {
    %c0 = arith.constant 0 : index
    %c0_0 = arith.constant 0 : index
    %0 = vector.load %arg1[%c0, %c0_0] : memref<128x8xbf16, #tpu.memory_space<vmem>>, vector<128x8xbf16>
    %c0_1 = arith.constant 0 : index
    %c0_2 = arith.constant 0 : index
    %1 = vector.load %arg4[%c0_1, %c0_2] : memref<8x16xbf16, #tpu.memory_space<vmem>>, vector<8x16xbf16>
    %cst = arith.constant dense<0.000000e+00> : vector<128x16xf32>
    %2 = tpu.matmul %0, %1, %cst {dimension_numbers = #tpu.dot_dimension_numbers<[1], [0], [0], [1], [0, 0, 1, 1], [], []>} : vector<128x8xbf16>, vector<8x16xbf16>, vector<128x16xf32> -> vector<128x16xf32>
    %c0_3 = arith.constant 0 : index
    %c0_4 = arith.constant 0 : index
    %3 = vector.load %arg2[%c0_3, %c0_4] : memref<128x8xbf16, #tpu.memory_space<vmem>>, vector<128x8xbf16>
    %c0_5 = arith.constant 0 : index
    %c0_6 = arith.constant 0 : index
    %4 = vector.load %arg5[%c0_5, %c0_6] : memref<8x16xbf16, #tpu.memory_space<vmem>>, vector<8x16xbf16>
    %cst_7 = arith.constant dense<0.000000e+00> : vector<128x16xf32>
    %5 = tpu.matmul %3, %4, %cst_7 {dimension_numbers = #tpu.dot_dimension_numbers<[1], [0], [0], [1], [0, 0, 1, 1], [], []>} : vector<128x8xbf16>, vector<8x16xbf16>, vector<128x16xf32> -> vector<128x16xf32>
    %6 = arith.addf %2, %5 : vector<128x16xf32>
    %c0_8 = arith.constant 0 : index
    %c0_9 = arith.constant 0 : index
    %7 = vector.load %arg6[%c0_8, %c0_9] : memref<1x16xf32, #tpu.memory_space<vmem>>, vector<1x16xf32>
    %8 = vector.broadcast %7 : vector<1x16xf32> to vector<128x16xf32>
    %9 = arith.addf %6, %8 : vector<128x16xf32>
    %10 = math.tanh %9 : vector<128x16xf32>
    %c0_10 = arith.constant 0 : index
    %c0_11 = arith.constant 0 : index
    %11 = vector.load %arg3[%c0_10, %c0_11] : memref<128x1xf32, #tpu.memory_space<vmem>>, vector<128x1xf32>
    %12 = vector.broadcast %11 : vector<128x1xf32> to vector<128x16xf32>
    %13 = arith.mulf %10, %12 : vector<128x16xf32>
    %14 = arith.truncf %13 : vector<128x16xf32> to vector<128x16xbf16>
    %c0_12 = arith.constant 0 : index
    %c0_13 = arith.constant 0 : index
    %15 = vector.load %arg9[%c0_12, %c0_13] : memref<128x16xbf16, #tpu.memory_space<vmem>>, vector<128x16xbf16>
    tpu.vector_store %arg9[%c0_12, %c0_13], %14 {strides = array<i32>} : memref<128x16xbf16, #tpu.memory_space<vmem>>, vector<128x16xbf16>,
    %c0_14 = arith.constant 0 : index
    %c0_15 = arith.constant 0 : index
    %16 = vector.load %arg1[%c0_14, %c0_15] : memref<128x8xbf16, #tpu.memory_space<vmem>>, vector<128x8xbf16>
    %c0_16 = arith.constant 0 : index
    %c0_17 = arith.constant 0 : index
    %17 = vector.load %arg7[%c0_16, %c0_17] : memref<8x4xbf16, #tpu.memory_space<vmem>>, vector<8x4xbf16>
    %cst_18 = arith.constant dense<0.000000e+00> : vector<128x4xf32>
    %18 = tpu.matmul %16, %17, %cst_18 {dimension_numbers = #tpu.dot_dimension_numbers<[1], [0], [0], [1], [0, 0, 1, 1], [], []>} : vector<128x8xbf16>, vector<8x4xbf16>, vector<128x4xf32> -> vector<128x4xf32>
    %c0_19 = arith.constant 0 : index
    %c0_20 = arith.constant 0 : index
    %19 = vector.load %arg8[%c0_19, %c0_20] : memref<1x4xf32, #tpu.memory_space<vmem>>, vector<1x4xf32>
    %20 = vector.broadcast %19 : vector<1x4xf32> to vector<128x4xf32>
    %21 = arith.addf %18, %20 : vector<128x4xf32>
    %22 = math.tanh %21 : vector<128x4xf32>
    %23 = arith.truncf %22 : vector<128x4xf32> to vector<128x4xbf16>
    %c0_21 = arith.constant 0 : index
    %c0_22 = arith.constant 0 : index
    %24 = vector.load %arg10[%c0_21, %c0_22] : memref<128x4xbf16, #tpu.memory_space<vmem>>, vector<128x4xbf16>
    tpu.vector_store %arg10[%c0_21, %c0_22], %23 {strides = array<i32>} : memref<128x4xbf16, #tpu.memory_space<vmem>>, vector<128x4xbf16>,
    return
  }
  func.func @transform_0(%arg0: i32) -> (i32, i32) {
    %c0_i32 = arith.constant 0 : i32
    %c0_i32_0 = arith.constant 0 : i32
    return %arg0, %c0_i32 : i32, i32
  }
  func.func @transform_1(%arg0: i32) -> (i32, i32) {
    %c0_i32 = arith.constant 0 : i32
    %c0_i32_0 = arith.constant 0 : i32
    return %arg0, %c0_i32 : i32, i32
  }
  func.func @transform_2(%arg0: i32) -> (i32, i32) {
    %c0_i32 = arith.constant 0 : i32
    %c0_i32_0 = arith.constant 0 : i32
    return %arg0, %c0_i32 : i32, i32
  }
  func.func @transform_3(%arg0: i32) -> (i32, i32) {
    %c0_i32 = arith.constant 0 : i32
    %c0_i32_0 = arith.constant 0 : i32
    %c0_i32_1 = arith.constant 0 : i32
    return %c0_i32, %c0_i32_0 : i32, i32
  }
  func.func @transform_4(%arg0: i32) -> (i32, i32) {
    %c0_i32 = arith.constant 0 : i32
    %c0_i32_0 = arith.constant 0 : i32
    %c0_i32_1 = arith.constant 0 : i32
    return %c0_i32, %c0_i32_0 : i32, i32
  }
  func.func @transform_5(%arg0: i32) -> (i32, i32) {
    %c0_i32 = arith.constant 0 : i32
    %c0_i32_0 = arith.constant 0 : i32
    %c0_i32_1 = arith.constant 0 : i32
    return %c0_i32, %c0_i32_0 : i32, i32
  }
  func.func @transform_6(%arg0: i32) -> (i32, i32) {
    %c0_i32 = arith.constant 0 : i32
    %c0_i32_0 = arith.constant 0 : i32
    %c0_i32_1 = arith.constant 0 : i32
    return %c0_i32, %c0_i32_0 : i32, i32
  }
  func.func @transform_7(%arg0: i32) -> (i32, i32) {
    %c0_i32 = arith.constant 0 : i32
    %c0_i32_0 = arith.constant 0 : i32
    %c0_i32_1 = arith.constant 0 : i32
    return %c0_i32, %c0_i32_0 : i32, i32
  }
  func.func @transform_8(%arg0: i32) -> (i32, i32) {
    %c0_i32 = arith.constant 0 : i32
    %c0_i32_0 = arith.constant 0 : i32
    return %arg0, %c0_i32 : i32, i32
  }
  func.func @transform_9(%arg0: i32) -> (i32, i32) {
    %c0_i32 = arith.constant 0 : i32
    %c0_i32_0 = arith.constant 0 : i32
    return %arg0, %c0_i32 : i32, i32
  }
}

</mosaic_0001>

<bundles_post_ra>
// kernel: tpu_custom_call.1
= control target key start
LH: loop header
LB: loop body
LE: loop exit
PB: predicated region body
PF: predicated region fallthrough
CT: control target
= control target key end

     0   :  { %vm131_vm0 = vcmask 1043456   ;;  %v892_v3 = vmov 0   ;;  %vm106_vm1 = vcmask 64512   ;;  %vm464_vm2 = vcmask 125952   ;;  %s1296_s4 = inlined_call_operand.vmem [shape: bf16[8,16], index: 4, kind: input, shape index: {}]   ;;  %s1297_s3 = inlined_call_operand.vmem [shape: bf16[8,16], index: 3, kind: input, shape index: {}]   ;;  %s1298_s6 = inlined_call_operand.vmem [shape: bf16[8,4], index: 6, kind: input, shape index: {}]   ;;  %s1299_s1 = inlined_call_operand.vmem [shape: bf16[128,8], index: 1, kind: input, shape index: {}]   ;;  %s1300_s0 = inlined_call_operand.vmem [shape: bf16[128,8], index: 0, kind: input, shape index: {}]   ;;  %s1301_s2 = inlined_call_operand.vmem [shape: f32[128,1], index: 2, kind: input, shape index: {}]   ;;  %s1302_s5 = inlined_call_operand.vmem [shape: f32[1,16], index: 5, kind: input, shape index: {}]   ;;  %s1303_s7 = inlined_call_operand.vmem [shape: f32[1,4], index: 7, kind: input, shape index: {}]   ;;  %s1304_s8 = inlined_call_operand.vmem [shape: bf16[128,16], index: 8, kind: output, shape index: {0}]   ;;  %s1305_s9 = inlined_call_operand.vmem [shape: bf16[128,4], index: 9, kind: output, shape index: {1}]  }
   0x1   :  { %v65_v0 = vld [vmem:[%s1296_s4] sm:$0xf]  ;;  %823 = vset.pattern.permute.xlu0 %v892_v3  ;;  %824 = vset.pattern.permute.xlu1 %v892_v3  ;;  %v809_v8 = vld [vmem:[%s1299_s1 + $0x30] sm:$0xff]  ;;  %v337_v13 = vld [vmem:[%s1301_s2 + $0x8] sm:$0xff]  ;;  %vm650_vm3 = vcmask 27648  }
   0x2   :  { %v48_v1 = vld [vmem:[%s1297_s3] sm:$0xf]  ;;  %v133_v4 = vsel %vm131_vm0, %v65_v0, 0  ;;  %825 = vset.pattern.permute.xlu2 %v892_v3  ;;  %v338_v12 = vld [vmem:[%s1301_s2 + $0x10] sm:$0xff]  ;;  %v339_v14 = vld [vmem:[%s1301_s2 + $0x18] sm:$0xff] }
   0x3   :  { %v497_v2 = vld [vmem:[%s1298_s6] sm:$0xf]  ;;  %v249_v5 = vsel %vm131_vm0, %v48_v1, 0  ;;  %142 = vmatpush.bf16.msra.mxu0 %v133_v4  ;;  %819 = vmatpush.bf16.msra.mxu3 %v133_v4  ;;  %v804_v15 = vld [vmem:[%s1299_s1 + $0x8] sm:$0xff]  ;;  %v810_v16 = vld [vmem:[%s1299_s1 + $0x38] sm:$0xff] }
   0x4   :  { %v567_v6 = vsel %vm131_vm0, %v497_v2, 0  ;;  %v803_v7 = vld [vmem:[%s1299_s1] sm:$0xff]  ;;  %258 = vmatpush.bf16.msra.mxu1 %v249_v5  ;;  %364 = vperm.xlu1 %824, %v338_v12   ;;  %v342_v17 = vld [vmem:[%s1301_s2 + $0x30] sm:$0xff]  ;;  %v796_v18 = vld [vmem:[%s1300_s0 + $0x8] sm:$0xff] }
   0x5   :  { %v795_v9 = vld [vmem:[%s1300_s0] sm:$0xff]  ;;  %576 = vmatpush.bf16.msra.mxu2 %v567_v6  ;;  %v812_v19 = vld [vmem:[%s1300_s0 + $0x8] sm:$0xff]  ;;  %v343_v20 = vld [vmem:[%s1301_s2 + $0x38] sm:$0xff] }
   0x6   :  { %v811_v10 = vld [vmem:[%s1300_s0] sm:$0xff]  ;;  %707 = vmatmul.msk.bf16.vlgmr.msra.gmra.mxu0 %vm106_vm1, %v803_v7  ;;  %713 = vmatmul.msk.bf16.vlgmr.msra.gmra.mxu3 %vm106_vm1, %v809_v8  ;;  %v345_v21 = vld [vmem:[%s1301_s2 + $0x48] sm:$0xff]  ;;  %v346_v22 = vld [vmem:[%s1301_s2 + $0x50] sm:$0xff] }
   0x7   :  { %v336_v11 = vld [vmem:[%s1301_s2] sm:$0xff]  ;;  %820 = vmatpush.bf16.msrb.mxu3 %v249_v5  ;;  %747 = vmatmul.msk.bf16.vlgmr.msra.gmra.mxu1 %vm106_vm1, %v795_v9  ;;  %v805_v23 = vld [vmem:[%s1299_s1 + $0x10] sm:$0xff]  ;;  %v349_v29 = vld [vmem:[%s1301_s2 + $0x68] sm:$0xff] }
   0x8   :  { %354 = vperm.xlu0 %823, %v336_v11   ;;  %787 = vmatmul.msk.bf16.vlgmr.msra.gmra.mxu2 %vm106_vm1, %v811_v10  ;;  %v801_v24 = vld [vmem:[%s1300_s0 + $0x30] sm:$0xff]  ;;  %v348_v25 = vld [vmem:[%s1301_s2 + $0x60] sm:$0xff]  ;;  %v351_v30 = vld [vmem:[%s1301_s2 + $0x78] sm:$0xff] }
   0x9   :  { %v797_v26 = vld [vmem:[%s1300_s0 + $0x10] sm:$0xff]  ;;  %v340_v28 = vld [vmem:[%s1301_s2 + $0x20] sm:$0xff]  ;;  %v341_v31 = vld [vmem:[%s1301_s2 + $0x28] sm:$0xff] }
   0xa   :  { %v813_v27 = vld [vmem:[%s1300_s0 + $0x10] sm:$0xff]  ;;  %374 = vperm.xlu2 %825, %v340_v28   ;;  %v806_v32 = vld [vmem:[%s1299_s1 + $0x18] sm:$0xff]  ;;  %v344_v36 = vld [vmem:[%s1301_s2 + $0x40] sm:$0xff] }
   0xb   :  { %821 = vmatpush.bf16.msra.mxu3 %v567_v6  ;;  %v802_v33 = vld [vmem:[%s1300_s0 + $0x38] sm:$0xff]  ;;  %v807_v38 = vld [vmem:[%s1299_s1 + $0x20] sm:$0xff]  ;;  %v817_v39 = vld [vmem:[%s1300_s0 + $0x30] sm:$0xff] }
   0xc   :  { %369 = vperm.xlu1 %824, %v339_v14   ;;  %v798_v34 = vld [vmem:[%s1300_s0 + $0x18] sm:$0xff]  ;;  %v799_v40 = vld [vmem:[%s1300_s0 + $0x20] sm:$0xff]  ;;  %v350_v42 = vld [vmem:[%s1301_s2 + $0x70] sm:$0xff] }
   0xd   :  { %v814_v35 = vld [vmem:[%s1300_s0 + $0x18] sm:$0xff]  ;;  %v815_v41 = vld [vmem:[%s1300_s0 + $0x20] sm:$0xff]  ;;  %v808_v43 = vld [vmem:[%s1299_s1 + $0x28] sm:$0xff] }
   0xe   :  { %v347_v37 = vld [vmem:[%s1301_s2 + $0x58] sm:$0xff]  ;;  %v800_v45 = vld [vmem:[%s1300_s0 + $0x28] sm:$0xff]  ;;  %v1099_v48 = vld [vmem:[%s1302_s5] ss:$0 sm:$0xff] }
   0xf   :  { %v818_v44 = vld [vmem:[%s1300_s0 + $0x38] sm:$0xff]  ;;  %v816_v46 = vld [vmem:[%s1300_s0 + $0x28] sm:$0xff]  ;;  %v1105_v52 = vld [vmem:[%s1303_s7] ss:$0 sm:$0xff] }
  0x10   :  { %359 = vperm.xlu0 %823, %v337_v13  }
  0x12   :  { %379 = vperm.xlu2 %825, %v341_v31  }
  0x14   :  { %389 = vperm.xlu1 %824, %v343_v20  }
  0x16   :  { %708 = vmatmul.msk.bf16.gmra.mxu0 %vm106_vm1, %v804_v15  ;;  %714 = vmatmul.msk.bf16.gmra.mxu3 %vm106_vm1, %v810_v16 }
  0x17   :  { %748 = vmatmul.msk.bf16.gmra.mxu1 %vm106_vm1, %v796_v18 }
  0x18   :  { %384 = vperm.xlu0 %823, %v342_v17   ;;  %788 = vmatmul.msk.bf16.gmra.mxu2 %vm106_vm1, %v812_v19 }
  0x1a   :  { %394 = vperm.xlu2 %825, %v344_v36  }
  0x1c   :  { %404 = vperm.xlu1 %824, %v346_v22  }
  0x20   :  { %399 = vperm.xlu0 %823, %v345_v21  }
  0x22   :  { %409 = vperm.xlu2 %825, %v347_v37  }
  0x24   :  { %419 = vperm.xlu1 %824, %v349_v29  }
  0x26   :  { %709 = vmatmul.msk.bf16.gmra.mxu0 %vm106_vm1, %v805_v23  ;;  %753 = vmatmul.msk.bf16.vlgmr.msrb.gmra.mxu3 %vm106_vm1, %v801_v24 }
  0x27   :  { %749 = vmatmul.msk.bf16.gmra.mxu1 %vm106_vm1, %v797_v26 }
  0x28   :  { %414 = vperm.xlu0 %823, %v348_v25   ;;  %789 = vmatmul.msk.bf16.gmra.mxu2 %vm106_vm1, %v813_v27 }
  0x2a   :  { %424 = vperm.xlu2 %825, %v350_v42  }
  0x30   :  { %429 = vperm.xlu0 %823, %v351_v30  }
  0x36   :  { %710 = vmatmul.msk.bf16.gmra.mxu0 %vm106_vm1, %v806_v32  ;;  %754 = vmatmul.msk.bf16.gmra.mxu3 %vm106_vm1, %v802_v33 }
  0x37   :  { %750 = vmatmul.msk.bf16.gmra.mxu1 %vm106_vm1, %v798_v34 }
  0x38   :  { %790 = vmatmul.msk.bf16.gmra.mxu2 %vm106_vm1, %v814_v35 }
  0x46   :  { %711 = vmatmul.msk.bf16.gmra.mxu0 %vm106_vm1, %v807_v38  ;;  %793 = vmatmul.msk.bf16.vlgmr.msra.gmra.mxu3 %vm106_vm1, %v817_v39 }
  0x47   :  { %751 = vmatmul.msk.bf16.gmra.mxu1 %vm106_vm1, %v799_v40 }
  0x48   :  { %791 = vmatmul.msk.bf16.gmra.mxu2 %vm106_vm1, %v815_v41 }
  0x56   :  { %712 = vmatmul.msk.bf16.gmra.mxu0 %vm106_vm1, %v808_v43  ;;  %794 = vmatmul.msk.bf16.gmra.mxu3 %vm106_vm1, %v818_v44 }
  0x57   :  { %752 = vmatmul.msk.bf16.gmra.mxu1 %vm106_vm1, %v800_v45 }
  0x58   :  { %792 = vmatmul.msk.bf16.gmra.mxu2 %vm106_vm1, %v816_v46 }
  0x64   :  { %v375_v16 = vpop.permute.xlu2 %374 }
  0x6c   :  { %v380_v36 = vpop.permute.xlu2 %379 }
  0x76   :  { %v365_v2 = vpop.permute.xlu1 %364 }
  0x7a   :  { %v355_v57 = vpop.permute.xlu0 %354 }
  0x7e   :  { %v370_v22 = vpop.permute.xlu1 %369 }
  0x82   :  { %v360_v9 = vpop.permute.xlu0 %359 }
  0x83   :  { %v144_v47 = vpop.f32.mrf.mxu0 }
  0x84   :  { %v260_v49 = vpop.f32.mrf.mxu1 }
  0x85   :  { %v261_v50 = vadd.f32 %v260_v49, %v144_v47 }
  0x86   :  { %v1148_v38 = vpop.permute.xlu1 %389 }
  0x87   :  { %v304_v51 = vadd.f32 %v1099_v48, %v261_v50 }
  0x89   :  { %828 = vtanh.f32 %v304_v51  ;;  %v1107_v53 = vpop.f32.mrf.mxu3 }
  0x8a   :  { %v1134_v24 = vpop.permute.xlu0 %384 }
  0x8b   :  { %v578_v54 = vpop.f32.mrf.mxu2  ;;  %v146_v56 = vpop.f32.mrf.mxu0 }
  0x8c   :  { %v579_v55 = vadd.f32 %v1105_v52, %v578_v54  ;;  %v262_v58 = vpop.f32.mrf.mxu1 }
  0x8d   :  { %v263_v59 = vadd.f32 %v262_v58, %v146_v56 }
  0x8e   :  { %830 = vtanh.f32 %v579_v55 }
  0x8f   :  { %v829_v60 = vpop.eup %828  ;;  %v305_v61 = vadd.f32 %v1099_v48, %v263_v59 }
  0x90   :  { %v432_v62 = vmul.f32 %v829_v60, %v355_v57  ;;  %v1167_v60 = vpop.permute.xlu1 %404 }
  0x91   :  { %832 = vtanh.f32 %v305_v61  ;;  %v1111_v63 = vpop.f32.mrf.mxu3 }
  0x92   :  { %v448_v0 = vpack.c.bf16 %v432_v62, %v432_v62  ;;  %v1151_v42 = vpop.permute.xlu0 %399 }
  0x93   :  { %v580_v1 = vpop.f32.mrf.mxu2  ;;  %v149_v5 = vpop.f32.mrf.mxu0 }
  0x94   :  { %v831_v3 = vpop.eup %830  ;;  %v581_v4 = vadd.f32 %v1105_v52, %v580_v1  ;;  %465 = vst.msk [vmem:[%s1304_s8] sm:$0xf] %vm464_vm2, %v448_v0  ;;  %v265_v7 = vpop.f32.mrf.mxu1 }
  0x95   :  { %v634_v6 = vpack.c.bf16 %v831_v3, %v831_v3  ;;  %v266_v8 = vadd.f32 %v265_v7, %v149_v5 }
  0x96   :  { %834 = vtanh.f32 %v581_v4 }
  0x97   :  { %651 = vst.msk [vmem:[%s1305_s9] sm:$0xf] %vm650_vm3, %v634_v6  ;;  %v833_v10 = vpop.eup %832  ;;  %v306_v11 = vadd.f32 %v1099_v48, %v266_v8 }
  0x98   :  { %v433_v12 = vmul.f32 %v833_v10, %v360_v9 }
  0x99   :  { %836 = vtanh.f32 %v306_v11  ;;  %v1123_v13 = vpop.f32.mrf.mxu3 }
  0x9a   :  { %v449_v14 = vpack.c.bf16 %v433_v12, %v433_v12 }
  0x9b   :  { %v583_v15 = vpop.f32.mrf.mxu2  ;;  %v151_v19 = vpop.f32.mrf.mxu0 }
  0x9c   :  { %v835_v17 = vpop.eup %834  ;;  %v584_v18 = vadd.f32 %v1105_v52, %v583_v15  ;;  %466 = vst.msk [vmem:[%s1304_s8 + $0x4] sm:$0xf] %vm464_vm2, %v449_v14  ;;  %v267_v21 = vpop.f32.mrf.mxu1 }
  0x9d   :  { %v635_v20 = vpack.c.bf16 %v835_v17, %v835_v17  ;;  %v268_v23 = vadd.f32 %v267_v21, %v151_v19  ;;  %v420_v21 = vpop.permute.xlu1 %419 }
  0x9e   :  { %838 = vtanh.f32 %v584_v18 }
  0x9f   :  { %652 = vst.msk [vmem:[%s1305_s9 + $0x4] sm:$0xf] %vm650_vm3, %v635_v20  ;;  %v837_v25 = vpop.eup %836  ;;  %v307_v26 = vadd.f32 %v1099_v48, %v268_v23 }
  0xa0   :  { %v434_v27 = vmul.f32 %v837_v25, %v365_v2  ;;  %v415_v2 = vpop.permute.xlu0 %414 }
  0xa1   :  { %840 = vtanh.f32 %v307_v26  ;;  %v1137_v28 = vpop.f32.mrf.mxu3 }
  0xa2   :  { %v450_v29 = vpack.c.bf16 %v434_v27, %v434_v27 }
  0xa3   :  { %v585_v30 = vpop.f32.mrf.mxu2  ;;  %v154_v33 = vpop.f32.mrf.mxu0 }
  0xa4   :  { %v839_v31 = vpop.eup %838  ;;  %v586_v32 = vadd.f32 %v1105_v52, %v585_v30  ;;  %467 = vst.msk [vmem:[%s1304_s8 + $0x8] sm:$0xf] %vm464_vm2, %v450_v29  ;;  %v270_v35 = vpop.f32.mrf.mxu1 }
  0xa5   :  { %v636_v34 = vpack.c.bf16 %v839_v31, %v839_v31  ;;  %v271_v37 = vadd.f32 %v270_v35, %v154_v33 }
  0xa6   :  { %842 = vtanh.f32 %v586_v32 }
  0xa7   :  { %653 = vst.msk [vmem:[%s1305_s9 + $0x8] sm:$0xf] %vm650_vm3, %v636_v34  ;;  %v841_v39 = vpop.eup %840  ;;  %v308_v40 = vadd.f32 %v1099_v48, %v271_v37 }
  0xa8   :  { %v435_v41 = vmul.f32 %v841_v39, %v370_v22 }
  0xa9   :  { %844 = vtanh.f32 %v308_v40  ;;  %v290_v43 = vpop.f32.mrf.mxu3 }
  0xaa   :  { %v451_v44 = vpack.c.bf16 %v435_v41, %v435_v41  ;;  %v291_v45 = vadd.f32 %v290_v43, %v1107_v53  ;;  %v1164_v53 = vpop.permute.xlu2 %394 }
  0xab   :  { %v588_v46 = vpop.f32.mrf.mxu2  ;;  %v156_v50 = vpop.f32.mrf.mxu0 }
  0xac   :  { %v843_v47 = vpop.eup %842  ;;  %v589_v49 = vadd.f32 %v1105_v52, %v588_v46  ;;  %468 = vst.msk [vmem:[%s1304_s8 + $0xc] sm:$0xf] %vm464_vm2, %v451_v44  ;;  %v316_v54 = vadd.f32 %v1099_v48, %v291_v45  ;;  %v272_v55 = vpop.f32.mrf.mxu1 }
  0xad   :  { %v637_v51 = vpack.c.bf16 %v843_v47, %v843_v47  ;;  %v273_v56 = vadd.f32 %v272_v55, %v156_v50 }
  0xae   :  { %846 = vtanh.f32 %v589_v49 }
  0xaf   :  { %654 = vst.msk [vmem:[%s1305_s9 + $0xc] sm:$0xf] %vm650_vm3, %v637_v51  ;;  %848 = vtanh.f32 %v316_v54  ;;  %v845_v57 = vpop.eup %844  ;;  %v309_v58 = vadd.f32 %v1099_v48, %v273_v56 }
  0xb0   :  { %v436_v59 = vmul.f32 %v845_v57, %v375_v16 }
  0xb1   :  { %850 = vtanh.f32 %v309_v58  ;;  %v292_v61 = vpop.f32.mrf.mxu3 }
  0xb2   :  { %v452_v62 = vpack.c.bf16 %v436_v59, %v436_v59  ;;  %v293_v0 = vadd.f32 %v292_v61, %v1111_v63  ;;  %v1181_v16 = vpop.permute.xlu2 %409 }
  0xb3   :  { %v590_v1 = vpop.f32.mrf.mxu2  ;;  %v159_v5 = vpop.f32.mrf.mxu0 }
  0xb4   :  { %v847_v3 = vpop.eup %846  ;;  %v591_v4 = vadd.f32 %v1105_v52, %v590_v1  ;;  %469 = vst.msk [vmem:[%s1304_s8 + $0x10] sm:$0xf] %vm464_vm2, %v452_v62  ;;  %v317_v8 = vadd.f32 %v1099_v48, %v293_v0  ;;  %v275_v9 = vpop.f32.mrf.mxu1 }
  0xb5   :  { %v849_v6 = vpop.eup %848  ;;  %v638_v7 = vpack.c.bf16 %v847_v3, %v847_v3  ;;  %v276_v10 = vadd.f32 %v275_v9, %v159_v5 }
  0xb6   :  { %852 = vtanh.f32 %v591_v4  ;;  %v444_v11 = vmul.f32 %v849_v6, %v415_v2 }
  0xb7   :  { %655 = vst.msk [vmem:[%s1305_s9 + $0x10] sm:$0xf] %vm650_vm3, %v638_v7  ;;  %854 = vtanh.f32 %v317_v8  ;;  %v851_v63 = vpop.eup %850  ;;  %v310_v12 = vadd.f32 %v1099_v48, %v276_v10 }
  0xb8   :  { %v460_v14 = vpack.c.bf16 %v444_v11, %v444_v11  ;;  %v437_v15 = vmul.f32 %v851_v63, %v380_v36 }
  0xb9   :  { %856 = vtanh.f32 %v310_v12  ;;  %v295_v17 = vpop.f32.mrf.mxu3 }
  0xba   :  { %477 = vst.msk [vmem:[%s1304_s8 + $0x30] sm:$0xf] %vm464_vm2, %v460_v14  ;;  %v453_v18 = vpack.c.bf16 %v437_v15, %v437_v15  ;;  %v296_v19 = vadd.f32 %v295_v17, %v1123_v13  ;;  %v425_v41 = vpop.permute.xlu2 %424 }
  0xbb   :  { %v593_v20 = vpop.f32.mrf.mxu2  ;;  %v161_v25 = vpop.f32.mrf.mxu0 }
  0xbc   :  { %v853_v22 = vpop.eup %852  ;;  %v594_v23 = vadd.f32 %v1105_v52, %v593_v20  ;;  %470 = vst.msk [vmem:[%s1304_s8 + $0x14] sm:$0xf] %vm464_vm2, %v453_v18  ;;  %v318_v29 = vadd.f32 %v1099_v48, %v296_v19  ;;  %v277_v30 = vpop.f32.mrf.mxu1 }
  0xbd   :  { %v855_v26 = vpop.eup %854  ;;  %v639_v27 = vpack.c.bf16 %v853_v22, %v853_v22  ;;  %v278_v31 = vadd.f32 %v277_v30, %v161_v25 }
  0xbe   :  { %858 = vtanh.f32 %v594_v23  ;;  %v445_v32 = vmul.f32 %v855_v26, %v420_v21 }
  0xbf   :  { %656 = vst.msk [vmem:[%s1305_s9 + $0x14] sm:$0xf] %vm650_vm3, %v639_v27  ;;  %860 = vtanh.f32 %v318_v29  ;;  %v857_v13 = vpop.eup %856  ;;  %v311_v33 = vadd.f32 %v1099_v48, %v278_v31 }
  0xc0   :  { %v461_v34 = vpack.c.bf16 %v445_v32, %v445_v32  ;;  %v438_v35 = vmul.f32 %v857_v13, %v1134_v24 }
  0xc1   :  { %862 = vtanh.f32 %v311_v33  ;;  %v297_v36 = vpop.f32.mrf.mxu3 }
  0xc2   :  { %478 = vst.msk [vmem:[%s1304_s8 + $0x34] sm:$0xf] %vm464_vm2, %v461_v34  ;;  %v454_v37 = vpack.c.bf16 %v438_v35, %v438_v35  ;;  %v298_v39 = vadd.f32 %v297_v36, %v1137_v28 }
  0xc3   :  { %v595_v40 = vpop.f32.mrf.mxu2  ;;  %v164_v45 = vpop.f32.mrf.mxu0 }
  0xc4   :  { %v859_v43 = vpop.eup %858  ;;  %v596_v44 = vadd.f32 %v1105_v52, %v595_v40  ;;  %471 = vst.msk [vmem:[%s1304_s8 + $0x18] sm:$0xf] %vm464_vm2, %v454_v37  ;;  %v319_v47 = vadd.f32 %v1099_v48, %v298_v39  ;;  %v280_v49 = vpop.f32.mrf.mxu1 }
  0xc5   :  { %v861_v46 = vpop.eup %860  ;;  %v640_v24 = vpack.c.bf16 %v859_v43, %v859_v43  ;;  %v281_v50 = vadd.f32 %v280_v49, %v164_v45 }
  0xc6   :  { %864 = vtanh.f32 %v596_v44  ;;  %v446_v51 = vmul.f32 %v861_v46, %v425_v41 }
  0xc7   :  { %657 = vst.msk [vmem:[%s1305_s9 + $0x18] sm:$0xf] %vm650_vm3, %v640_v24  ;;  %866 = vtanh.f32 %v319_v47  ;;  %v863_v28 = vpop.eup %862  ;;  %v312_v54 = vadd.f32 %v1099_v48, %v281_v50 }
  0xc8   :  { %v462_v55 = vpack.c.bf16 %v446_v51, %v446_v51  ;;  %v439_v56 = vmul.f32 %v863_v28, %v1148_v38  ;;  %v430_v38 = vpop.permute.xlu0 %429 }
  0xc9   :  { %868 = vtanh.f32 %v312_v54  ;;  %v608_v57 = vpop.f32.mrf.mxu3 }
  0xca   :  { %479 = vst.msk [vmem:[%s1304_s8 + $0x38] sm:$0xf] %vm464_vm2, %v462_v55  ;;  %v455_v58 = vpack.c.bf16 %v439_v56, %v439_v56  ;;  %v609_v61 = vadd.f32 %v1105_v52, %v608_v57 }
  0xcb   :  { %v598_v59 = vpop.f32.mrf.mxu2  ;;  %v166_v1 = vpop.f32.mrf.mxu0 }
  0xcc   :  { %v865_v62 = vpop.eup %864  ;;  %v599_v0 = vadd.f32 %v1105_v52, %v598_v59  ;;  %472 = vst.msk [vmem:[%s1304_s8 + $0x1c] sm:$0xf] %vm464_vm2, %v455_v58  ;;  %870 = vtanh.f32 %v609_v61  ;;  %v282_v4 = vpop.f32.mrf.mxu1 }
  0xcd   :  { %v867_v2 = vpop.eup %866  ;;  %v641_v3 = vpack.c.bf16 %v865_v62, %v865_v62  ;;  %v283_v6 = vadd.f32 %v282_v4, %v166_v1 }
  0xce   :  { %v447_v5 = vmul.f32 %v867_v2, %v430_v38  ;;  %872 = vtanh.f32 %v599_v0 }
  0xcf   :  { %658 = vst.msk [vmem:[%s1305_s9 + $0x1c] sm:$0xf] %vm650_vm3, %v641_v3  ;;  %v869_v7 = vpop.eup %868  ;;  %v313_v9 = vadd.f32 %v1099_v48, %v283_v6 }
  0xd0   :  { %v463_v8 = vpack.c.bf16 %v447_v5, %v447_v5  ;;  %v440_v10 = vmul.f32 %v869_v7, %v1164_v53 }
  0xd1   :  { %874 = vtanh.f32 %v313_v9  ;;  %v610_v11 = vpop.f32.mrf.mxu3 }
  0xd2   :  { %480 = vst.msk [vmem:[%s1304_s8 + $0x3c] sm:$0xf] %vm464_vm2, %v463_v8  ;;  %v871_v63 = vpop.eup %870  ;;  %v456_v12 = vpack.c.bf16 %v440_v10, %v440_v10  ;;  %v611_v15 = vadd.f32 %v1105_v52, %v610_v11 }
  0xd3   :  { %v600_v14 = vpop.f32.mrf.mxu2  ;;  %v646_v18 = vpack.c.bf16 %v871_v63, %v871_v63  ;;  %v169_v20 = vpop.f32.mrf.mxu0 }
  0xd4   :  { %v873_v17 = vpop.eup %872  ;;  %v601_v19 = vadd.f32 %v1105_v52, %v600_v14  ;;  %473 = vst.msk [vmem:[%s1304_s8 + $0x20] sm:$0xf] %vm464_vm2, %v456_v12  ;;  %876 = vtanh.f32 %v611_v15  ;;  %v285_v21 = vpop.f32.mrf.mxu1 }
  0xd5   :  { %v642_v53 = vpack.c.bf16 %v873_v17, %v873_v17  ;;  %663 = vst.msk [vmem:[%s1305_s9 + $0x30] sm:$0xf] %vm650_vm3, %v646_v18  ;;  %v286_v22 = vadd.f32 %v285_v21, %v169_v20 }
  0xd6   :  { %878 = vtanh.f32 %v601_v19 }
  0xd7   :  { %659 = vst.msk [vmem:[%s1305_s9 + $0x20] sm:$0xf] %vm650_vm3, %v642_v53  ;;  %v875_v23 = vpop.eup %874  ;;  %v314_v25 = vadd.f32 %v1099_v48, %v286_v22 }
  0xd8   :  { %v441_v26 = vmul.f32 %v875_v23, %v1151_v42 }
  0xd9   :  { %880 = vtanh.f32 %v314_v25  ;;  %v613_v27 = vpop.f32.mrf.mxu3 }
  0xda   :  { %v877_v29 = vpop.eup %876  ;;  %v457_v30 = vpack.c.bf16 %v441_v26, %v441_v26  ;;  %v614_v32 = vadd.f32 %v1105_v52, %v613_v27 }
  0xdb   :  { %v603_v31 = vpop.f32.mrf.mxu2  ;;  %v647_v33 = vpack.c.bf16 %v877_v29, %v877_v29  ;;  %v171_v35 = vpop.f32.mrf.mxu0 }
  0xdc   :  { %v879_v13 = vpop.eup %878  ;;  %v604_v34 = vadd.f32 %v1105_v52, %v603_v31  ;;  %474 = vst.msk [vmem:[%s1304_s8 + $0x24] sm:$0xf] %vm464_vm2, %v457_v30  ;;  %882 = vtanh.f32 %v614_v32  ;;  %v287_v42 = vpop.f32.mrf.mxu1 }
  0xdd   :  { %v643_v36 = vpack.c.bf16 %v879_v13, %v879_v13  ;;  %664 = vst.msk [vmem:[%s1305_s9 + $0x34] sm:$0xf] %vm650_vm3, %v647_v33  ;;  %v288_v37 = vadd.f32 %v287_v42, %v171_v35 }
  0xde   :  { %884 = vtanh.f32 %v604_v34 }
  0xdf   :  { %660 = vst.msk [vmem:[%s1305_s9 + $0x24] sm:$0xf] %vm650_vm3, %v643_v36  ;;  %v881_v39 = vpop.eup %880  ;;  %v315_v40 = vadd.f32 %v1099_v48, %v288_v37 }
  0xe0   :  { %v442_v41 = vmul.f32 %v881_v39, %v1167_v60 }
  0xe1   :  { %886 = vtanh.f32 %v315_v40  ;;  %v615_v43 = vpop.f32.mrf.mxu3 }
  0xe2   :  { %v883_v44 = vpop.eup %882  ;;  %v458_v45 = vpack.c.bf16 %v442_v41, %v442_v41  ;;  %v616_v24 = vadd.f32 %v1105_v52, %v615_v43 }
  0xe3   :  { %v605_v46 = vpop.f32.mrf.mxu2  ;;  %v648_v49 = vpack.c.bf16 %v883_v44, %v883_v44 }
  0xe4   :  { %v885_v47 = vpop.eup %884  ;;  %v606_v50 = vadd.f32 %v1105_v52, %v605_v46  ;;  %475 = vst.msk [vmem:[%s1304_s8 + $0x28] sm:$0xf] %vm464_vm2, %v458_v45  ;;  %888 = vtanh.f32 %v616_v24 }
  0xe5   :  { %v644_v51 = vpack.c.bf16 %v885_v47, %v885_v47  ;;  %665 = vst.msk [vmem:[%s1305_s9 + $0x38] sm:$0xf] %vm650_vm3, %v648_v49 }
  0xe6   :  { %890 = vtanh.f32 %v606_v50 }
  0xe7   :  { %661 = vst.msk [vmem:[%s1305_s9 + $0x28] sm:$0xf] %vm650_vm3, %v644_v51  ;;  %v887_v48 = vpop.eup %886 }
  0xe8   :  { %v443_v52 = vmul.f32 %v887_v48, %v1181_v16 }
  0xea   :  { %v889_v60 = vpop.eup %888  ;;  %v459_v28 = vpack.c.bf16 %v443_v52, %v443_v52 }
  0xeb   :  { %v649_v55 = vpack.c.bf16 %v889_v60, %v889_v60 }
  0xec   :  { %v891_v54 = vpop.eup %890  ;;  %476 = vst.msk [vmem:[%s1304_s8 + $0x2c] sm:$0xf] %vm464_vm2, %v459_v28 }
  0xed   :  { %v645_v56 = vpack.c.bf16 %v891_v54, %v891_v54  ;;  %666 = vst.msk [vmem:[%s1305_s9 + $0x3c] sm:$0xf] %vm650_vm3, %v649_v55 }
  0xef   :  { %662 = vst.msk [vmem:[%s1305_s9 + $0x2c] sm:$0xf] %vm650_vm3, %v645_v56 }

</bundles_post_ra>
